<compile_context>
chip_gen: v6e
topology: v6e:2x2x1
jax: 0.10.0
libtpu: 0.0.40
codegen_flags: <defaults>
</compile_context>

<pallas_src>
import functools

import jax
import jax.numpy as jnp
from jax.experimental import pallas as pl
from jax.experimental.pallas import tpu as pltpu

SUBLANE = 8


def _round_up(n, m):
    return ((n + m - 1) // m) * m


@functools.lru_cache(maxsize=1)
def _num_tensorcores():
    """Best-effort TensorCore count per chip (2 on v7x-class, else 1)."""
    try:
        info = pltpu.get_tpu_info()
        for attr in ("num_cores", "core_count", "num_tensorcores", "tensorcores"):
            v = getattr(info, attr, None)
            if isinstance(v, int) and v > 0:
                return v
    except Exception:
        pass
    try:
        kind = str(getattr(jax.devices()[0], "device_kind", "")).lower()
        if "v7" in kind:
            return 2
    except Exception:
        pass
    return 1


def policy_kernel(x_ref, wt_ref, bt_ref, wf_ref, bf_ref, o_ref):
    # Cast activations to the weight dtype (bf16 fast path) in-kernel: no
    # wrapper-side pad/cast pass over x.
    x = x_ref[...].astype(wt_ref.dtype)
    # trunk: h = relu(x @ Wt + bt)      (Wt pre-transposed: [D_in, H])
    h = jnp.dot(x, wt_ref[...], preferred_element_type=jnp.float32)
    h = jnp.maximum(h + bt_ref[...], 0.0)           # bias + ReLU in f32 (VPU)
    # fc1: logits = h @ Wf + bf         (Wf pre-transposed: [H, A])
    logits = jnp.dot(h.astype(wf_ref.dtype), wf_ref[...],
                     preferred_element_type=jnp.float32)
    o_ref[...] = (logits + bf_ref[...]).astype(o_ref.dtype)


def prepare_policy_params(w_trunk, b_trunk, w_fc1, b_fc1, *, use_bf16=True):
    """One-time weight prep (hoisted out of the per-call path).

    Transposes PyTorch-layout weights to [in, out] and casts matmul operands to
    bf16 (f32 accumulate). No zero padding: every feature dim (D_in, H, A)
    rides the full-array-dim exception of the (8,128) rule, and the weights are
    whole, VMEM-resident blocks.
    """
    mat_dtype = jnp.bfloat16 if use_bf16 else jnp.float32
    wt = jnp.asarray(w_trunk).T.astype(mat_dtype)        # [D_in, H]
    wf = jnp.asarray(w_fc1).T.astype(mat_dtype)          # [H, A]
    bt = jnp.asarray(b_trunk, jnp.float32)[None, :]      # [1, H]
    bf = jnp.asarray(b_fc1, jnp.float32)[None, :]        # [1, A]
    return wt, bt, wf, bf


def _choose_tile_b(batch, tile_b, num_cores):
    """Batch tile: fewest steps on 1-TC chips, even balanced steps on 2-TC."""
    cap = max(SUBLANE, _round_up(tile_b, SUBLANE))
    b8 = _round_up(batch, SUBLANE)
    if num_cores <= 1 or b8 <= 2 * SUBLANE:
        # v5e/v6e (1 TC): the grid is a serial loop -> one block whenever it
        # fits under the cap (per-step overhead ~0.35us is pure loss).
        return min(b8, cap)
    # v7x-class (2 TCs): each core has its own HBM path -> prefer exactly 2
    # balanced "parallel" steps; for very large B keep the step count even.
    half = _round_up(pl.cdiv(batch, 2), SUBLANE)
    if half <= cap:
        return half
    steps = pl.cdiv(batch, cap)
    steps += steps % 2
    return max(SUBLANE, _round_up(pl.cdiv(batch, steps), SUBLANE))


@functools.partial(jax.jit, static_argnames=("tile_b",))
def policy_forward(x, wt, bt, wf, bf, *, tile_b=4096):
    """Fused trunk(Linear+ReLU) -> fc1 forward.

    x:  [B, D_in] activations (any float dtype; cast in-kernel)
    wt: [D_in, H] pre-transposed trunk weight   (from prepare_policy_params)
    bt: [1, H]    trunk bias
    wf: [H, A]    pre-transposed fc1 weight
    bf: [1, A]    fc1 bias
    returns [B, A] float32 logits
    """
    B, D_in = x.shape
    H, A = wf.shape

    tb = _choose_tile_b(B, tile_b, _num_tensorcores())
    grid = (pl.cdiv(B, tb),)

    # VMEM audit: double-buffered x tile + out tile + (tiny, resident) weights.
    footprint = (2 * tb * (D_in * x.dtype.itemsize + A * 4)
                 + 2 * (wt.size * wt.dtype.itemsize
                        + wf.size * wf.dtype.itemsize
                        + bt.size * 4 + bf.size * 4))
    cp_kwargs = dict(dimension_semantics=("parallel",))
    if footprint > 12 * 1024 * 1024:   # above the smallest (v5e) scoped default
        cp_kwargs["vmem_limit_bytes"] = min(int(footprint * 1.5) + (1 << 20),
                                            48 * 1024 * 1024)

    return pl.pallas_call(
        policy_kernel,
        out_shape=jax.ShapeDtypeStruct((B, A), jnp.float32),
        grid_spec=pltpu.PrefetchScalarGridSpec(
            num_scalar_prefetch=0,
            grid=grid,
            in_specs=[
                pl.BlockSpec((tb, D_in), lambda i: (i, 0)),  # x tile (batch-gridded)
                pl.BlockSpec((D_in, H), lambda i: (0, 0)),   # trunk weight (whole)
                pl.BlockSpec((1, H), lambda i: (0, 0)),      # trunk bias
                pl.BlockSpec((H, A), lambda i: (0, 0)),      # fc1 weight (whole)
                pl.BlockSpec((1, A), lambda i: (0, 0)),      # fc1 bias
            ],
            out_specs=pl.BlockSpec((tb, A), lambda i: (i, 0)),
        ),
        compiler_params=pltpu.CompilerParams(**cp_kwargs),
    )(x, wt, bt, wf, bf)


def _init_linear(key, fan_in, fan_out):
    """Deterministic nn.Linear-style init: U(-1/sqrt(fan_in), 1/sqrt(fan_in))."""
    kw, kb = jax.random.split(key)
    bound = 1.0 / jnp.sqrt(jnp.float32(fan_in))
    w = jax.random.uniform(kw, (fan_out, fan_in), jnp.float32, -bound, bound)
    b = jax.random.uniform(kb, (fan_out,), jnp.float32, -bound, bound)
    return w, b


if __name__ == "__main__":
    key = jax.random.PRNGKey(0)
    k_x, k_x2, k_trunk, k_fc1 = jax.random.split(key, 4)

    # Small shapes implied by the module: trunk emits 64 features, fc1: 64 -> A.
    B, D_in, H, A = 8, 32, 64, 8

    w_trunk, b_trunk = _init_linear(k_trunk, D_in, H)   # trunk: Linear(D_in, 64)
    w_fc1, b_fc1 = _init_linear(k_fc1, H, A)            # fc1:   Linear(64, A)

    def reference(xx):
        h_ref = jnp.maximum(xx @ w_trunk.T + b_trunk, 0.0)
        return h_ref @ w_fc1.T + b_fc1

    # --- f32 path: must match the pure-JAX reference tightly ---------------
    params_f32 = prepare_policy_params(w_trunk, b_trunk, w_fc1, b_fc1,
                                       use_bf16=False)
    x = jax.random.normal(k_x, (B, D_in), jnp.float32)
    out_f32 = jax.block_until_ready(policy_forward(x, *params_f32))
    assert out_f32.shape == (B, A)
    assert jnp.allclose(out_f32, reference(x), atol=1e-4, rtol=1e-4), \
        "f32 mismatch vs reference"

    # --- default fast path: bf16 MXU operands, f32 accumulate --------------
    params = prepare_policy_params(w_trunk, b_trunk, w_fc1, b_fc1)
    out = jax.block_until_ready(policy_forward(x, *params))
    assert out.shape == (B, A)
    assert jnp.allclose(out, reference(x), atol=3e-2, rtol=3e-2), \
        "bf16 mismatch vs reference"

    # --- non-multiple-of-8 batch: exercises the masked partial block -------
    B2 = 200
    x2 = jax.random.normal(k_x2, (B2, D_in), jnp.float32)
    out2 = jax.block_until_ready(policy_forward(x2, *params_f32))
    assert out2.shape == (B2, A)
    assert jnp.allclose(out2, reference(x2), atol=1e-4, rtol=1e-4), \
        "partial-block mismatch vs reference"

    print("KERNEL_OK")
</pallas_src>

<mosaic_0001>
module attributes {stable_mosaic.version = 11 : i64} {
  func.func @policy_kernel(%arg0: i32, %arg1: memref<8x32xf32, #tpu.memory_space<vmem>>, %arg2: memref<32x64xf32, #tpu.memory_space<vmem>>, %arg3: memref<1x64xf32, #tpu.memory_space<vmem>>, %arg4: memref<64x8xf32, #tpu.memory_space<vmem>>, %arg5: memref<1x8xf32, #tpu.memory_space<vmem>>, %arg6: memref<8x8xf32, #tpu.memory_space<vmem>>) attributes {dimension_semantics = [#tpu.dimension_semantics<parallel>], iteration_bounds = array<i64: 1>, scalar_prefetch = 0 : i64, scratch_operands = 0 : i64, tpu.core_type = #tpu.core_type<tc>, window_params = [{transform_indices = @transform_0, window_bounds = array<i64: 8, 32>}, {pipeline_mode = #tpu.pipeline_mode<synchronous>, transform_indices = @transform_1, window_bounds = array<i64: 32, 64>}, {pipeline_mode = #tpu.pipeline_mode<synchronous>, transform_indices = @transform_2, window_bounds = array<i64: 1, 64>}, {pipeline_mode = #tpu.pipeline_mode<synchronous>, transform_indices = @transform_3, window_bounds = array<i64: 64, 8>}, {pipeline_mode = #tpu.pipeline_mode<synchronous>, transform_indices = @transform_4, window_bounds = array<i64: 1, 8>}, {transform_indices = @transform_5, window_bounds = array<i64: 8, 8>}]} {
    %c0 = arith.constant 0 : index
    %c0_0 = arith.constant 0 : index
    %0 = vector.load %arg1[%c0, %c0_0] : memref<8x32xf32, #tpu.memory_space<vmem>>, vector<8x32xf32>
    %c0_1 = arith.constant 0 : index
    %c0_2 = arith.constant 0 : index
    %1 = vector.load %arg2[%c0_1, %c0_2] : memref<32x64xf32, #tpu.memory_space<vmem>>, vector<32x64xf32>
    %cst = arith.constant dense<0.000000e+00> : vector<8x64xf32>
    %2 = tpu.matmul %0, %1, %cst {dimension_numbers = #tpu.dot_dimension_numbers<[1], [0], [0], [1], [0, 0, 1, 1], [], []>} : vector<8x32xf32>, vector<32x64xf32>, vector<8x64xf32> -> vector<8x64xf32>
    %c0_3 = arith.constant 0 : index
    %c0_4 = arith.constant 0 : index
    %3 = vector.load %arg3[%c0_3, %c0_4] : memref<1x64xf32, #tpu.memory_space<vmem>>, vector<1x64xf32>
    %4 = vector.broadcast %3 : vector<1x64xf32> to vector<8x64xf32>
    %5 = arith.addf %2, %4 : vector<8x64xf32>
    %cst_5 = arith.constant 0.000000e+00 : f32
    %6 = vector.broadcast %cst_5 : f32 to vector<8x64xf32>
    %7 = arith.maximumf %5, %6 : vector<8x64xf32>
    %c0_6 = arith.constant 0 : index
    %c0_7 = arith.constant 0 : index
    %8 = vector.load %arg4[%c0_6, %c0_7] : memref<64x8xf32, #tpu.memory_space<vmem>>, vector<64x8xf32>
    %cst_8 = arith.constant dense<0.000000e+00> : vector<8x8xf32>
    %9 = tpu.matmul %7, %8, %cst_8 {dimension_numbers = #tpu.dot_dimension_numbers<[1], [0], [0], [1], [0, 0, 1, 1], [], []>} : vector<8x64xf32>, vector<64x8xf32>, vector<8x8xf32> -> vector<8x8xf32>
    %c0_9 = arith.constant 0 : index
    %c0_10 = arith.constant 0 : index
    %10 = vector.load %arg5[%c0_9, %c0_10] : memref<1x8xf32, #tpu.memory_space<vmem>>, vector<1x8xf32>
    %11 = vector.broadcast %10 : vector<1x8xf32> to vector<8x8xf32>
    %12 = arith.addf %9, %11 : vector<8x8xf32>
    %c0_11 = arith.constant 0 : index
    %c0_12 = arith.constant 0 : index
    %13 = vector.load %arg6[%c0_11, %c0_12] : memref<8x8xf32, #tpu.memory_space<vmem>>, vector<8x8xf32>
    tpu.vector_store %arg6[%c0_11, %c0_12], %12 {strides = array<i32>} : memref<8x8xf32, #tpu.memory_space<vmem>>, vector<8x8xf32>,
    return
  }
  func.func @transform_0(%arg0: i32) -> (i32, i32) {
    %c0_i32 = arith.constant 0 : i32
    %c0_i32_0 = arith.constant 0 : i32
    return %arg0, %c0_i32 : i32, i32
  }
  func.func @transform_1(%arg0: i32) -> (i32, i32) {
    %c0_i32 = arith.constant 0 : i32
    %c0_i32_0 = arith.constant 0 : i32
    %c0_i32_1 = arith.constant 0 : i32
    return %c0_i32, %c0_i32_0 : i32, i32
  }
  func.func @transform_2(%arg0: i32) -> (i32, i32) {
    %c0_i32 = arith.constant 0 : i32
    %c0_i32_0 = arith.constant 0 : i32
    %c0_i32_1 = arith.constant 0 : i32
    return %c0_i32, %c0_i32_0 : i32, i32
  }
  func.func @transform_3(%arg0: i32) -> (i32, i32) {
    %c0_i32 = arith.constant 0 : i32
    %c0_i32_0 = arith.constant 0 : i32
    %c0_i32_1 = arith.constant 0 : i32
    return %c0_i32, %c0_i32_0 : i32, i32
  }
  func.func @transform_4(%arg0: i32) -> (i32, i32) {
    %c0_i32 = arith.constant 0 : i32
    %c0_i32_0 = arith.constant 0 : i32
    %c0_i32_1 = arith.constant 0 : i32
    return %c0_i32, %c0_i32_0 : i32, i32
  }
  func.func @transform_5(%arg0: i32) -> (i32, i32) {
    %c0_i32 = arith.constant 0 : i32
    %c0_i32_0 = arith.constant 0 : i32
    return %arg0, %c0_i32 : i32, i32
  }
}

</mosaic_0001>

<bundles_post_ra>
// kernel: policy_forward.1
= control target key start
LH: loop header
LB: loop body
LE: loop exit
PB: predicated region body
PF: predicated region fallthrough
CT: control target
= control target key end

     0   :  { %v286_v1 = vmov 0.0   ;;  %vm287_vm0 = vmmov 0   ;;  %s369_s0 = inlined_call_operand.vmem [shape: f32[8,32], index: 0, kind: input, shape index: {}]   ;;  %s370_s1 = inlined_call_operand.vmem [shape: f32[32,64], index: 1, kind: input, shape index: {}]   ;;  %s371_s2 = inlined_call_operand.vmem [shape: f32[1,64], index: 2, kind: input, shape index: {}]   ;;  %s372_s3 = inlined_call_operand.vmem [shape: f32[64,8], index: 3, kind: input, shape index: {}]   ;;  %s373_s4 = inlined_call_operand.vmem [shape: f32[1,8], index: 4, kind: input, shape index: {}]   ;;  %s374_s5 = inlined_call_operand.hbm [shape: f32[8,8], index: 5, kind: output, shape index: {}]  }
   0x1   :  { %v25_v0 = vld [vmem:[%s370_s1 + $0x18] sm:$0xff]  ;;  %231 = vmatprep.subr.mxu0 %v286_v1  ;;  %v24_v2 = vld [vmem:[%s370_s1 + $0x10] sm:$0xff]  ;;  %239 = vmatprep.mubr.msk.f32.mxu0 %vm287_vm0, %v286_v1  ;;  %v23_v5 = vld [vmem:[%s370_s1 + $0x8] sm:$0xff] }
   0x2   :  { %v115_v3 = vld [vmem:[%s372_s3 + $0x38] sm:$0xff]  ;;  %232 = vmatpush3.msra.mxu0 %v25_v0  ;;  %242 = vmatprep.subr.mxu1 %v286_v1  ;;  %v114_v4 = vld [vmem:[%s372_s3 + $0x30] sm:$0xff] }
   0x3   :  { %233 = vmatprep.subr.mxu0 %v286_v1  ;;  %243 = vmatpush3.msra.mxu1 %v115_v3 }
   0x4   :  { %10 = vsyncpa [#allocation3], 0  ;;  %234 = vmatpush3.msra.mxu0 %v24_v2  ;;  %244 = vmatprep.subr.mxu1 %v286_v1  ;;  %v113_v6 = vld [vmem:[%s372_s3 + $0x28] sm:$0xff]  ;;  %v22_v7 = vld [vmem:[%s370_s1] sm:$0xff]  ;;  %vm33_vm1 = vcmask 261120   ;;  %vm123_vm2 = vcmask 523264  }
   0x5   :  { %235 = vmatprep.subr.mxu0 %v286_v1  ;;  %245 = vmatpush3.msra.mxu1 %v114_v4  ;;  %v21_v8 = vld [vmem:[%s369_s0] sm:$0xff]  ;;  %v111_v10 = vld [vmem:[%s372_s3 + $0x18] sm:$0xff]  ;;  %v110_v11 = vld [vmem:[%s372_s3 + $0x10] sm:$0xff]  ;;  %s288_s21 = smov [#allocation2]   ;;  %vm197_vm3 = vcmask 64512  }
   0x6   :  { %236 = vmatpush3.msra.mxu0 %v23_v5  ;;  %246 = vmatprep.subr.mxu1 %v286_v1  ;;  %v112_v9 = vld [vmem:[%s372_s3 + $0x20] sm:$0xff]  ;;  %v109_v12 = vld [vmem:[%s372_s3 + $0x8] sm:$0xff]  ;;  %s205_s22 = sshll.u32 %s288_s21, 4  ;;  %s206_s22 = int_to_ptr.vmem [resolvable:$true] %s205_s22 }
   0x7   :  { %237 = vmatprep.subr.mxu0 %v286_v1  ;;  %247 = vmatpush3.msra.mxu1 %v113_v6  ;;  %v108_v13 = vld [vmem:[%s372_s3] sm:$0xff]  ;;  %s264_s3 = scalar_lea.vmem %s206_s22, 128  ;;  %p269_p1 = scmp.lt.s32.totalorder %s206_s22, %s206_s22 }
   0x8   :  { %238 = vmatpush3.msra.mxu0 %v22_v7  ;;  %248 = vmatprep.subr.mxu1 %v286_v1  ;;  %v213_v14 = vld [vmem:[%s371_s2] ss:$0 sm:$0xff]  ;;  %p265_p0 = scmp.ne.s32.totalorder %s206_s22, %s264_s3  ;;  %p270_p2 = scmp.lt.s32.totalorder %s264_s3, %s264_s3 }
   0x9   :  { %240 = vmatmul.mubr.msk.f32.vlgmr.msra.gmra.mxu0 %vm33_vm1, %v21_v8  ;;  %249 = vmatpush3.msra.mxu1 %v112_v9  ;;  %v215_v19 = vld [vmem:[%s373_s4] ss:$0 sm:$0xff] }
   0xa   :  { %250 = vmatprep.subr.mxu1 %v286_v1  ;;  %258 = vmatprep.mubr.msk.f32.mxu1 %vm287_vm0, %v286_v1  ;;  %p271_p3 = por %p270_p2, %p269_p1 }
   0xb   :  { %251 = vmatpush3.msra.mxu1 %v111_v10 }
   0xc   :  { %252 = vmatprep.subr.mxu1 %v286_v1  ;;  %p272_p4 = pnand %p271_p3, %p265_p0 }
   0xd   :  { %253 = vmatpush3.msra.mxu1 %v110_v11 }
   0xe   :  { %254 = vmatprep.subr.mxu1 %v286_v1 }
   0xf   :  { %255 = vmatpush3.msra.mxu1 %v109_v12 }
  0x10   :  { %256 = vmatprep.subr.mxu1 %v286_v1 }
  0x11   :  { %257 = vmatpush3.msra.mxu1 %v108_v13 }
  0xc9   :  { %v103_v15 = vpop.f32.mrf.mxu0 }
  0xca   :  { %v104_v16 = vadd.f32 %v213_v14, %v103_v15 }
  0xcb   :  { %v241_v17 = vpop.f32.mrf.mxu0 }
  0xcc   :  { %v107_v18 = vmax.f32 %v104_v16, 0.0 }
  0xce   :  { %259 = vmatmul.mubr.msk.f32.vlgmr.msra.gmra.mxu1 %vm123_vm2, %v107_v18 }
 0x18e   :  { %v193_v20 = vpop.f32.mrf.mxu1 }
 0x18f   :  { %v194_v21 = vadd.f32 %v215_v19, %v193_v20 }
 0x190   :  { %v260_v22 = vpop.f32.mrf.mxu1 }
 0x191   :  { %198 = vst.msk [vmem:[#allocation2] sm:$0xff] %vm197_vm3, %v194_v21 }
 0x192   :  { %275 = shalt.err (!%p272_p4)
}
 0x193   :  { %208 = dma.vmem_to_hbm [thread:$0]  %s206_s22, 128, %s374_s5, [#allocation3]  }
 0x194   :  { %284 = dma.done.wait [#allocation3], 128  }
 0x195   :  { %285 = vsyncadd [#allocation3], 4294967168 }
 0x196   :  { %212 = vsyncpa [#allocation3], 1 }

</bundles_post_ra>
